<compile_context>
chip_gen: v7x
topology: tpu7x:2x2x1
jax: 0.10.0
libtpu: 0.0.40
codegen_flags: <defaults>
</compile_context>

<pallas_src>
import functools

import numpy as np
import jax
import jax.numpy as jnp
from jax.experimental import pallas as pl
from jax.experimental.pallas import tpu as pltpu


def _enc_channels(org_channels: int) -> int:
    # Faithful to the PyTorch module (the `+= 1` branch is dead since ceil(x/6)*2 is even).
    ch = int(np.ceil(org_channels / 6) * 2)
    if ch % 2:
        ch += 1
    return ch


def _coeff_table(org_channels: int) -> np.ndarray:
    """Per output channel c: value(x,y,z) = sin(fx[c]*x + fy[c]*y + fz[c]*z + phase[c]).

    Channel order matches the PyTorch module:
      [sin_x | cos_x | sin_y | cos_y | sin_z | cos_z][:org_channels]
    (cos(t) is realized as sin(t + pi/2)).
    """
    ch = _enc_channels(org_channels)
    c2 = ch // 2
    inv_freq = 1.0 / (10000.0 ** (np.arange(0, ch, 2, dtype=np.float32) / np.float32(ch)))
    freqs = np.concatenate([inv_freq, inv_freq]).astype(np.float32)      # sin half, cos half
    phase = np.concatenate([np.zeros(c2, np.float32),
                            np.full(c2, np.pi / 2, np.float32)])
    fx = np.zeros(3 * ch, np.float32)
    fy = np.zeros(3 * ch, np.float32)
    fz = np.zeros(3 * ch, np.float32)
    ph = np.concatenate([phase, phase, phase]).astype(np.float32)
    fx[:ch] = freqs
    fy[ch:2 * ch] = freqs
    fz[2 * ch:] = freqs
    table = np.stack([fx, fy, fz, ph], axis=1)   # (3*ch, 4)
    return np.ascontiguousarray(table[:org_channels])  # truncation == emb[..., :orig_ch]


def _pos_enc_kernel(coef_ref, pos_ref, out_ref, enc_ref):
    # coef_ref: (C, 4)  columns = [fx, fy, fz, phase]        (resident)
    # pos_ref:  (8, TS) rows    = [ix, iy, iz, 0, ...]        (tiled along S)
    # out_ref:  (1, C, TS) output tile for batch b, S-tile s
    # enc_ref:  (C, TS) VMEM scratch holding the batch-invariant encoding for this S tile
    b = pl.program_id(1)

    @pl.when(b == 0)
    def _():
        ix = pos_ref[0:1, :]                      # (1, TS) broadcast rows
        iy = pos_ref[1:2, :]
        iz = pos_ref[2:3, :]
        fx = coef_ref[:, 0:1]                     # (C, 1) broadcast cols
        fy = coef_ref[:, 1:2]
        fz = coef_ref[:, 2:3]
        ph = coef_ref[:, 3:4]
        arg = fx * ix + fy * iy + fz * iz + ph    # (C, TS), f32
        enc_ref[...] = jnp.sin(arg).astype(enc_ref.dtype)

    # For every batch element this is just a lane-dense store of the cached tile.
    out_ref[0] = enc_ref[...]


def _pick_spatial_tile(C, S, itemsize, max_tile=2048, budget_bytes=10 * 1024 * 1024):
    """Largest multiple-of-128 lane tile that keeps (2x out tile + scratch + pos) small."""
    s128 = ((S + 127) // 128) * 128
    # bytes per lane of tile: out tile double-buffered + scratch (out dtype) + pos table (f32, x2)
    per_lane = 3 * C * itemsize + 2 * 8 * 4
    ts = (budget_bytes // per_lane) // 128 * 128
    return int(max(128, min(ts, max_tile, s128)))


def positional_encoding_permute_3d(x):
    """x: (B, C, X, Y, Z) -> positional encoding of the same shape/dtype."""
    B, C, X, Y, Z = x.shape
    S = X * Y * Z
    out_dtype = x.dtype
    itemsize = jnp.dtype(out_dtype).itemsize

    ts = _pick_spatial_tile(C, S, itemsize)
    ns = -(-S // ts)                      # ceil-div; last tile's stores are masked by Pallas
    s_pad = ns * ts                       # index table padded so every input block is in-bounds

    coef = jnp.asarray(_coeff_table(C))   # (C, 4) float32

    # Precompute spatial indices outside the kernel (tiny XLA op) -> no in-kernel div/mod.
    s_idx = jnp.arange(s_pad, dtype=jnp.int32)
    ix = (s_idx // (Y * Z)).astype(jnp.float32)
    iy = ((s_idx // Z) % Y).astype(jnp.float32)
    iz = (s_idx % Z).astype(jnp.float32)
    pos = (jnp.zeros((8, s_pad), jnp.float32)
           .at[0].set(ix).at[1].set(iy).at[2].set(iz))

    out_flat = pl.pallas_call(
        _pos_enc_kernel,
        out_shape=jax.ShapeDtypeStruct((B, C, S), out_dtype),
        grid=(ns, B),
        in_specs=[
            pl.BlockSpec((C, 4), lambda s, b: (0, 0)),    # resident coefficient table
            pl.BlockSpec((8, ts), lambda s, b: (0, s)),   # spatial index tile
        ],
        out_specs=pl.BlockSpec((1, C, ts), lambda s, b: (b, 0, s)),
        scratch_shapes=[pltpu.VMEM((C, ts), out_dtype)],
        compiler_params=pltpu.CompilerParams(
            dimension_semantics=("parallel", "arbitrary")),
        cost_estimate=pl.CostEstimate(
            flops=7 * C * S,
            transcendentals=C * S,
            bytes_accessed=B * C * S * itemsize),
    )(coef, pos)
    return out_flat.reshape(B, C, X, Y, Z)


def _reference(x):
    """Pure-JAX transcription of the PyTorch forward, for correctness checking."""
    B, C, X, Y, Z = x.shape
    ch = _enc_channels(C)
    inv_freq = jnp.asarray(
        1.0 / (10000.0 ** (np.arange(0, ch, 2, dtype=np.float32) / np.float32(ch))))
    pos_x = jnp.arange(X, dtype=jnp.float32)
    pos_y = jnp.arange(Y, dtype=jnp.float32)
    pos_z = jnp.arange(Z, dtype=jnp.float32)
    sx = pos_x[:, None] * inv_freq[None, :]
    sy = pos_y[:, None] * inv_freq[None, :]
    sz = pos_z[:, None] * inv_freq[None, :]
    emb_x = jnp.concatenate([jnp.sin(sx), jnp.cos(sx)], -1)[:, None, None, :]
    emb_y = jnp.concatenate([jnp.sin(sy), jnp.cos(sy)], -1)[None, :, None, :]
    emb_z = jnp.concatenate([jnp.sin(sz), jnp.cos(sz)], -1)[None, None, :, :]
    emb = jnp.concatenate([
        jnp.broadcast_to(emb_x, (X, Y, Z, ch)),
        jnp.broadcast_to(emb_y, (X, Y, Z, ch)),
        jnp.broadcast_to(emb_z, (X, Y, Z, ch)),
    ], axis=-1)[..., :C].astype(x.dtype)
    out = jnp.broadcast_to(emb[None], (B, X, Y, Z, C))
    return jnp.transpose(out, (0, 4, 1, 2, 3))  # back to (B, C, X, Y, Z)


def _check(shape, dtype, atol, rtol):
    key = jax.random.PRNGKey(0)
    x = jax.random.normal(key, shape, dtype=jnp.float32).astype(dtype)
    out = jax.block_until_ready(positional_encoding_permute_3d(x))
    ref = _reference(x)
    assert out.shape == x.shape and out.dtype == x.dtype
    np.testing.assert_allclose(np.asarray(out).astype(np.float32),
                               np.asarray(ref).astype(np.float32),
                               atol=atol, rtol=rtol)


if __name__ == "__main__":
    # Small shapes consistent with the module's (B, ch, x, y, z) input.
    _check((2, 8, 6, 5, 7), jnp.float32, atol=1e-5, rtol=1e-5)     # single tile, masked tail
    _check((2, 16, 8, 8, 36), jnp.float32, atol=2e-5, rtol=1e-5)   # multi-tile path
    _check((2, 8, 6, 5, 7), jnp.bfloat16, atol=2e-2, rtol=0.0)     # low-precision output
    print("KERNEL_OK")
</pallas_src>

<mosaic_0001>
module attributes {stable_mosaic.version = 11 : i64} {
  func.func @_pos_enc_kernel(%arg0: i32, %arg1: i32, %arg2: memref<8x4xf32, #tpu.memory_space<vmem>>, %arg3: memref<8x256xf32, #tpu.memory_space<vmem>>, %arg4: memref<1x8x256xf32, #tpu.memory_space<vmem>>, %arg5: memref<8x256xf32, #tpu.memory_space<vmem>>) attributes {dimension_semantics = [#tpu.dimension_semantics<parallel>, #tpu.dimension_semantics<arbitrary>], iteration_bounds = array<i64: 1, 2>, scalar_prefetch = 0 : i64, scratch_operands = 1 : i64, tpu.core_type = #tpu.core_type<tc>, window_params = [{pipeline_mode = #tpu.pipeline_mode<synchronous>, transform_indices = @transform_0, window_bounds = array<i64: 8, 4>}, {transform_indices = @transform_1, window_bounds = array<i64: 8, 256>}, {transform_indices = @transform_2, window_bounds = array<i64: 1, 8, 256>}]} {
    %c0_i32 = arith.constant 0 : i32
    %0 = arith.cmpi eq, %arg1, %c0_i32 : i32
    %1 = arith.extui %0 : i1 to i32
    %c0_i32_0 = arith.constant 0 : i32
    %2 = arith.cmpi ne, %1, %c0_i32_0 : i32
    scf.if %2 {
      %c0_5 = arith.constant 0 : index
      %c0_6 = arith.constant 0 : index
      %7 = vector.load %arg3[%c0_5, %c0_6] : memref<8x256xf32, #tpu.memory_space<vmem>>, vector<1x256xf32>
      %c1 = arith.constant 1 : index
      %c0_7 = arith.constant 0 : index
      %8 = vector.load %arg3[%c1, %c0_7] : memref<8x256xf32, #tpu.memory_space<vmem>>, vector<1x256xf32>
      %c2 = arith.constant 2 : index
      %c0_8 = arith.constant 0 : index
      %9 = vector.load %arg3[%c2, %c0_8] : memref<8x256xf32, #tpu.memory_space<vmem>>, vector<1x256xf32>
      %c0_9 = arith.constant 0 : index
      %c0_10 = arith.constant 0 : index
      %10 = vector.load %arg2[%c0_9, %c0_10] : memref<8x4xf32, #tpu.memory_space<vmem>>, vector<8x1xf32>
      %c0_11 = arith.constant 0 : index
      %c1_12 = arith.constant 1 : index
      %11 = vector.load %arg2[%c0_11, %c1_12] : memref<8x4xf32, #tpu.memory_space<vmem>>, vector<8x1xf32>
      %c0_13 = arith.constant 0 : index
      %c2_14 = arith.constant 2 : index
      %12 = vector.load %arg2[%c0_13, %c2_14] : memref<8x4xf32, #tpu.memory_space<vmem>>, vector<8x1xf32>
      %c0_15 = arith.constant 0 : index
      %c3 = arith.constant 3 : index
      %13 = vector.load %arg2[%c0_15, %c3] : memref<8x4xf32, #tpu.memory_space<vmem>>, vector<8x1xf32>
      %14 = vector.broadcast %10 : vector<8x1xf32> to vector<8x256xf32>
      %15 = vector.broadcast %7 : vector<1x256xf32> to vector<8x256xf32>
      %16 = arith.mulf %14, %15 : vector<8x256xf32>
      %17 = vector.broadcast %11 : vector<8x1xf32> to vector<8x256xf32>
      %18 = vector.broadcast %8 : vector<1x256xf32> to vector<8x256xf32>
      %19 = arith.mulf %17, %18 : vector<8x256xf32>
      %20 = arith.addf %16, %19 : vector<8x256xf32>
      %21 = vector.broadcast %12 : vector<8x1xf32> to vector<8x256xf32>
      %22 = vector.broadcast %9 : vector<1x256xf32> to vector<8x256xf32>
      %23 = arith.mulf %21, %22 : vector<8x256xf32>
      %24 = arith.addf %20, %23 : vector<8x256xf32>
      %25 = vector.broadcast %13 : vector<8x1xf32> to vector<8x256xf32>
      %26 = arith.addf %24, %25 : vector<8x256xf32>
      %27 = math.sin %26 : vector<8x256xf32>
      %c0_16 = arith.constant 0 : index
      %c0_17 = arith.constant 0 : index
      %28 = vector.load %arg5[%c0_16, %c0_17] : memref<8x256xf32, #tpu.memory_space<vmem>>, vector<8x256xf32>
      tpu.vector_store %arg5[%c0_16, %c0_17], %27 {strides = array<i32>} : memref<8x256xf32, #tpu.memory_space<vmem>>, vector<8x256xf32>,
    } else {
    }
    %c0 = arith.constant 0 : index
    %c0_1 = arith.constant 0 : index
    %3 = vector.load %arg5[%c0, %c0_1] : memref<8x256xf32, #tpu.memory_space<vmem>>, vector<8x256xf32>
    %c0_2 = arith.constant 0 : index
    %c0_3 = arith.constant 0 : index
    %c0_4 = arith.constant 0 : index
    %4 = vector.load %arg4[%c0_2, %c0_3, %c0_4] : memref<1x8x256xf32, #tpu.memory_space<vmem>>, vector<1x8x256xf32>
    %5 = vector.shape_cast %4 : vector<1x8x256xf32> to vector<8x256xf32>
    %6 = vector.shape_cast %3 : vector<8x256xf32> to vector<1x8x256xf32>
    tpu.vector_store %arg4[%c0_2, %c0_3, %c0_4], %6 {strides = array<i32>} : memref<1x8x256xf32, #tpu.memory_space<vmem>>, vector<1x8x256xf32>,
    return
  }
  func.func @transform_0(%arg0: i32, %arg1: i32) -> (i32, i32) {
    %c0_i32 = arith.constant 0 : i32
    %c0_i32_0 = arith.constant 0 : i32
    %c0_i32_1 = arith.constant 0 : i32
    return %c0_i32, %c0_i32_0 : i32, i32
  }
  func.func @transform_1(%arg0: i32, %arg1: i32) -> (i32, i32) {
    %c0_i32 = arith.constant 0 : i32
    %c0_i32_0 = arith.constant 0 : i32
    return %c0_i32, %arg0 : i32, i32
  }
  func.func @transform_2(%arg0: i32, %arg1: i32) -> (i32, i32, i32) {
    %c0_i32 = arith.constant 0 : i32
    %c0_i32_0 = arith.constant 0 : i32
    return %arg1, %c0_i32, %arg0 : i32, i32, i32
  }
}

</mosaic_0001>

<bundles_post_ra>
// kernel: tpu_custom_call.1
= control target key start
LH: loop header
LB: loop body
LE: loop exit
PB: predicated region body
PF: predicated region fallthrough
CT: control target
= control target key end

     0   :  { %7 = vsyncpa [#allocation4], 0  ;;  %s1006_s0 = inlined_call_operand.vmem [shape: f32[8,4], index: 0, kind: input, shape index: {}]   ;;  %s1007_s1 = inlined_call_operand.hbm [shape: f32[8,256], index: 1, kind: input, shape index: {}]   ;;  %s1008_s2 = inlined_call_operand.hbm [shape: f32[2,8,210], index: 2, kind: output, shape index: {}]  }
   0x1   :  { %8 = vsyncpa [#allocation5], 0 }
   0x2   :  { %10 = vsyncpa [#allocation5 + $0x1], 0  ;;  %s792_s9 = smov 0   ;;  %s794_s10 = smov 0  }
   0x3   :  { %s796_s11 = smov 0   ;;  %s798_s12 = smov 0  }
   0x4   :  { %s800_s13 = smov 0   ;;  %s802_s14 = smov 0  }
   0x5 LB: > { %s534_s15 = sadd.s32 4294967295, %s763_s14   ;;  %s535_s16 = sadd.s32 4294967294, %s763_s14   ;;  %s763_s14 = sphi %s802_s14, %s16_s14   ;;  %s759_s13 = sphi %s800_s13, %s1026_s13   ;;  %s755_s12 = sphi %s798_s12, %s1025_s12   ;;  %s751_s11 = sphi %s796_s11, %s1024_s11   ;;  %s747_s10 = sphi %s794_s10, %s1023_s10   ;;  %s743_s9 = sphi %s792_s9, %s1022_s9  }
   0x6   : > { %s25_s17 = sadd.s32 1, %s759_s13  ;;  %s84_s18 = sadd.s32 1, %s751_s11 }
   0x7   : > { %p26_p0 = scmp.ge.s32.totalorder %s25_s17, 2  ;;  %p94_p1 = scmp.ne.s32.totalorder %s751_s11, %s747_s10 }
   0x8   : > { %p95_p2 = scmp.eq.s32.totalorder %s534_s15, 1  ;;  %p100_p3 = scmp.ne.s32.totalorder %s747_s10, %s743_s9 }
   0x9   : > { %s1028_s17 = smov (%p26_p0, %s25_s17), 0  ;;  %p101_p5 = scmp.eq.s32.totalorder %s535_s16, 1 }
   0xa   : > { %p832_p4 = por %p95_p2, %p94_p1  ;;  %s79_s20 = ssub.s32 %s759_s13, %s1028_s17 }
   0xb   : > { %p536_p6 = scmp.ge.s32.totalorder %s763_s14, 1  ;;  %p82_p7 = scmp.eq.s32.totalorder %s79_s20, 0 }
   0xc   : > { %s1013_s19 = scalar_select %p832_p4, 1, 0 }
   0xd   : > { %p839_p8 = por %p101_p5, %p100_p3  ;;  %p108_p9 = scmp.lt.s32.totalorder %s763_s14, 3 }
   0xe   : > { %s845_s22 = scalar_select %p82_p7, %s751_s11, %s84_s18  }
   0xf   : > { %s1014_s21 = scalar_select %p839_p8, 1, 0 }
  0x10   : > { %p847_p10 = pnand %p536_p6, %p108_p9  ;;  %p851_p11 = scmp.eq.s32.totalorder %s534_s15, 0 }
  0x11   : > { %s765_s25 = smov [#allocation3]   ;;  %s653_s30 = scalar_lea.hbm %s1007_s1, 256 }
  0x12   : > { %s1015_s23 = scalar_select %p847_p10, 1, 0 }
  0x13   : > { %s1016_s24 = scalar_select %p851_p11, 1, 0 }
  0x14   : > { %p570_p12 = pneg %p847_p10  ;;  %s127_s26 = sshll.u32 %s765_s25, 4  ;;  %s128_s26 = int_to_ptr.vmem [resolvable:$true] %s127_s26 }
  0x15   : > { %p654_p0 = scmp.ne.s32.totalorder %s1007_s1, %s653_s30  ;;  %p660_p5 = scmp.lt.u32.totalorder %s653_s30, %s1007_s1 }
  0x16   : > { %p859_p13 = pnand %p851_p11, %p570_p12 }
  0x18   : > { %p655_p1 = pneg %p859_p13 }
  0x1a   : > { %p656_p2 = pnand %p655_p1, %p654_p0 }
  0x1c   : > { %p657_p3 = pneg %p656_p2 }
  0x1e   : > { %p662_p6 = pnand %p660_p5, %p657_p3 }
  0x20   : > { %665 = shalt.err (!%p662_p6)
}
  0x21   : > { %s666_s7 = scalar_lea.vmem %s128_s26, 256  ;;  %p674_p8 = scmp.lt.s32.totalorder %s128_s26, %s128_s26 }
  0x22   : > { %p667_p7 = scmp.ne.s32.totalorder %s128_s26, %s666_s7  ;;  %p675_p4 = scmp.lt.s32.totalorder %s666_s7, %s666_s7 }
  0x24   : > { %p669_p9 = pnand %p667_p7, %p655_p1  ;;  %p676_p11 = por %p675_p4, %p674_p8 }
  0x26   : > { %p670_p12 = pneg %p669_p9 }
  0x28   : > { %p677_p10 = pnand %p676_p11, %p670_p12 }
  0x2a   : > { %680 = shalt.err (!%p677_p10)
}
  0x2b   : > { %573 = dma.hbm_to_vmem [thread:$0]  (!%p859_p13), %s1007_s1, 256, %s128_s26, [#allocation4]  }
  0x2c   : > { %p1018_p0 = scmp.ne.s32.totalorder %s1015_s23, 0 }
  0x2d   : > { %p1019_p2 = scmp.ne.s32.totalorder (!%p1018_p0), %s1016_s24, 0 }
  0x2e   : > { %140 = sbr.rel (%p1018_p0) target bundleno = 313 (0x139), region = 28 }
  0x35   : > { %734 = dma.done.wait (%p1019_p2), [#allocation4], 256  }
  0x36   : > { %736 = vsyncadd (%p1019_p2), [#allocation4], 4294967040  ;;  %s154_s16 = sand.u32 1, %s747_s10   ;;  %p541_p4 = scmp.ne.s32.totalorder %s755_s12, 0 }
  0x37   : > { %s540_s18 = sshll.u32 %s154_s16, 4  ;;  %v168_v0 = vld [vmem:[%s1006_s0] sm:$0xff] (!%p541_p4)  ;;  %v766_v1 = vmov (!%p541_p4), 0   ;;  %v767_v2 = vmov (!%p541_p4), 2   ;;  %v768_v3 = vmov (!%p541_p4), 1   ;;  %v769_v4 = vmov (!%p541_p4), 3  }
  0x38   : > { %s888_s20 = scalar_lea.vmem [#allocation6], %s540_s18  ;;  %162 = sbr.rel (%p541_p4) target bundleno = 288 (0x120), region = 36  ;;  %640 = vset.pattern.permute.xlu0 (!%p541_p4), %v766_v1  ;;  %642 = vset.pattern.permute.xlu1 (!%p541_p4), %v767_v2  ;;  %v175_v5 = vlaneseq (!%p541_p4)  ;;  %v163_v9 = vld [vmem:[#allocation3] ss:$8 sm:$0x3] (!%p541_p4) }
  0x39   : > { %171 = vperm.xlu0 (!%p541_p4), %640, %v168_v0   ;;  %207 = vperm.xlu1 (!%p541_p4), %642, %v168_v0   ;;  %v165_v10 = vld [vmem:[#allocation3 + $0x1] ss:$8 sm:$0x3] (!%p541_p4)  ;;  %v167_v11 = vld [vmem:[#allocation3 + $0x2] ss:$8 sm:$0x3] (!%p541_p4) }
  0x3a   : > { %v176_v6 = vshrl.u32 (!%p541_p4), %v175_v5, 7  ;;  %v770_v54 = vmov (!%p541_p4), 683565275   ;;  %v771_v58 = vmov (!%p541_p4), 2475754826  }
  0x3b   : > { %v772_v60 = vmov (!%p541_p4), 2131351028   ;;  %v773_v62 = vmov (!%p541_p4), 2102212464  }
  0x3c   : > { %v177_v7 = vsub.s32 (!%p541_p4), 0, %v176_v6  ;;  %v181_v8 = vsub.s32 (!%p541_p4), 1, %v176_v6 }
  0x3d   : > { %641 = vset.pattern.permute.xlu0 (!%p541_p4), %v768_v3  ;;  %643 = vset.pattern.permute.xlu1 (!%p541_p4), %v769_v4 }
  0x3e   : > { %188 = vperm.xlu0 (!%p541_p4), %641, %v168_v0   ;;  %226 = vperm.xlu1 (!%p541_p4), %643, %v168_v0   ;;  %v178_v13 = vrot.slane (!%p541_p4), %v163_v9, %v177_v7  ;;  %v182_v14 = vrot.slane (!%p541_p4), %v163_v9, %v181_v8  ;;  %v195_v15 = vrot.slane (!%p541_p4), %v165_v10, %v177_v7  ;;  %v774_v0 = vmov (!%p541_p4), 920167782  }
  0x3f   : > { %v199_v16 = vrot.slane %v165_v10, %v181_v8  ;;  %v214_v17 = vrot.slane %v167_v11, %v177_v7  ;;  %v218_v18 = vrot.slane %v167_v11, %v181_v8  ;;  %v775_v7 = vmov 1326507024  }
  0x42   : > { %644 = vset.pattern.permute.xlu0 %v769_v4 }
  0xb8   : > { %v172_v12 = vpop.permute.xlu0 %171  ;;  %v208_v19 = vpop.permute.xlu1 %207 }
  0xb9   : > { %v185_v20 = vmul.f32 %v178_v13, %v172_v12  ;;  %v186_v21 = vmul.f32 %v182_v14, %v172_v12  ;;  %v221_v25 = vmul.f32 %v214_v17, %v208_v19  ;;  %v222_v26 = vmul.f32 %v218_v18, %v208_v19 }
  0xbd   : > { %v189_v22 = vpop.permute.xlu0 %188  ;;  %v227_v29 = vpop.permute.xlu1 %226 }
  0xbe   : > { %v202_v23 = vmul.f32 %v195_v15, %v189_v22  ;;  %v203_v24 = vmul.f32 %v199_v16, %v189_v22 }
  0xc0   : > { %v204_v27 = vadd.f32 %v202_v23, %v185_v20  ;;  %v205_v28 = vadd.f32 %v203_v24, %v186_v21 }
  0xc2   : > { %v223_v30 = vadd.f32 %v221_v25, %v204_v27  ;;  %v224_v31 = vadd.f32 %v222_v26, %v205_v28 }
  0xc4   : > { %v894_v32 = vadd.f32 %v227_v29, %v223_v30  ;;  %v896_v33 = vadd.f32 %v227_v29, %v224_v31 }
  0xc6   : > { %v231_v34 = vand.u32 2147483647, %v894_v32  ;;  %v234_v35 = vand.u32 2139095040, %v894_v32  ;;  %v338_v36 = vand.u32 2139095040, %v896_v33  ;;  %v335_v39 = vand.u32 2147483647, %v896_v33 }
  0xc7   : > { %vm233_vm14 = vcmp.lt.s32.totalorder %v894_v32, 0 }
  0xc8   : > { %v235_v37 = vshrl.u32 %v234_v35, 23  ;;  %v238_v38 = vand.u32 8388607, %v231_v34  ;;  %v339_v40 = vshrl.u32 %v338_v36, 23  ;;  %v906_v45 = vand.u32 8388607, %v335_v39 }
  0xc9   : > { %vm232_vm15 = vcmp.le.f32.partialorder %v231_v34, 0.7853982 }
  0xca   : > { %v542_v41 = vadd.s32 4294967169, %v235_v37  ;;  %v546_v42 = vadd.s32 4294967169, %v339_v40  ;;  %v239_v44 = vor.u32 8388608, %v238_v38  ;;  %v343_v52 = vor.u32 8388608, %v906_v45 }
  0xcc   : > { %v241_v43 = vadd.s32 1, %v542_v41  ;;  %v345_v46 = vadd.s32 1, %v546_v42  ;;  %v908_v51 = vshll.u32 %v239_v44, 8 }
  0xce   : > { %vm242_vm0 = vcmp.gt.s32.totalorder %v241_v43, 0  ;;  %vm346_vm1 = vcmp.gt.s32.totalorder %v345_v46, 0 }
  0xcf   : > { %v243_v47 = vsel %vm242_vm0, %v241_v43, 0  ;;  %v347_v50 = vsel %vm346_vm1, %v345_v46, 0  ;;  %v383_v46 = vshll.u32 %v343_v52, 8  ;;  %vm337_vm0 = vcmp.lt.s32.totalorder %v896_v33, 0 }
  0xd0   : > { %v244_v48 = vshrl.u32 %v243_v47, 5  ;;  %v245_v49 = vand.u32 31, %v243_v47  ;;  %v911_v56 = vshrl.u32 %v347_v50, 5  ;;  %v349_v57 = vand.u32 31, %v347_v50 }
  0xd1   : > { %vm336_vm1 = vcmp.le.f32.partialorder %v335_v39, 0.7853982 }
  0xd2   : > { %v246_v53 = vsub.s32 32, %v245_v49  ;;  %v248_v55 = vshll.u32 %v770_v54, %v245_v49  ;;  %v251_v59 = vshll.u32 %v771_v58, %v245_v49  ;;  %v254_v61 = vshll.u32 %v772_v60, %v245_v49 }
  0xd3   : > { %v257_v63 = vshll.u32 %v773_v62, %v245_v49  ;;  %v260_v1 = vshll.u32 %v774_v0, %v245_v49  ;;  %vm263_vm2 = vcmp.lt.s32.totalorder %v244_v48, 1  ;;  %vm264_vm3 = vcmp.lt.s32.totalorder %v244_v48, 2 }
  0xd4   : > { %v249_v2 = vshrl.u32 %v771_v58, %v246_v53  ;;  %v252_v3 = vshrl.u32 %v772_v60, %v246_v53  ;;  %v255_v4 = vshrl.u32 %v773_v62, %v246_v53  ;;  %v247_v5 = vshrl.u32 %v770_v54, %v246_v53 }
  0xd5   : > { %v258_v6 = vshrl.u32 %v774_v0, %v246_v53  ;;  %v261_v8 = vshrl.u32 %v775_v7, %v246_v53  ;;  %v350_v12 = vsub.s32 32, %v349_v57  ;;  %vm265_vm4 = vcmp.lt.s32.totalorder %v244_v48, 3 }
  0xd6   : > { %v250_v9 = vor.u32 %v249_v2, %v248_v55  ;;  %v253_v10 = vor.u32 %v252_v3, %v251_v59  ;;  %v256_v11 = vor.u32 %v255_v4, %v254_v61  ;;  %vm266_vm5 = vcmp.lt.s32.totalorder %v244_v48, 4 }
  0xd7   : > { %v259_v13 = vor.u32 %v258_v6, %v257_v63  ;;  %v262_v14 = vor.u32 %v261_v8, %v260_v1  ;;  %v352_v22 = vshll.u32 %v770_v54, %v349_v57  ;;  %v353_v25 = vshrl.u32 %v771_v58, %v350_v12 }
  0xd8   : > { %v267_v15 = vsel %vm263_vm2, %v247_v5, %v250_v9  ;;  %v268_v16 = vsel %vm266_vm5, %v256_v11, 2102212464  ;;  %v271_v17 = vsel %vm263_vm2, %v250_v9, %v253_v10  ;;  %v275_v18 = vsel %vm263_vm2, %v253_v10, %v256_v11 }
  0xd9   : > { %v269_v19 = vsel %vm265_vm4, %v253_v10, %v268_v16  ;;  %v272_v20 = vsel %vm266_vm5, %v259_v13, 920167782  ;;  %v276_v21 = vsel %vm266_vm5, %v262_v14, 1326507024  ;;  %v355_v26 = vshll.u32 %v771_v58, %v349_v57 }
  0xda   : > { %v273_v23 = vsel %vm265_vm4, %v256_v11, %v272_v20  ;;  %v277_v24 = vsel %vm265_vm4, %v259_v13, %v276_v21  ;;  %v270_v27 = vsel %vm264_vm3, %v267_v15, %v269_v19  ;;  %v356_v30 = vshrl.u32 %v772_v60, %v350_v12 }
  0xdb   : > { %v274_v28 = vsel %vm264_vm3, %v271_v17, %v273_v23  ;;  %v278_v29 = vsel %vm264_vm3, %v275_v18, %v277_v24  ;;  %v354_v38 = vor.u32 %v353_v25, %v352_v22  ;;  %v358_v41 = vshll.u32 %v772_v60, %v349_v57 }
  0xdc   : > { %v920_v31 = vmul.u32.u64.low %v908_v51, %v278_v29  ;;  %v921_v35 = vmul.u32.u64.high %v908_v51, %v278_v29, %v920_v31  ;;  %v924_v36 = vmul.u32.u64.low %v908_v51, %v274_v28  ;;  %v925_v37 = vmul.u32.u64.high %v908_v51, %v274_v28, %v924_v36 }
  0xdd   : > { %v357_v40 = vor.u32 %v356_v30, %v355_v26  ;;  %v359_v42 = vshrl.u32 %v773_v62, %v350_v12  ;;  %v361_v43 = vshll.u32 %v773_v62, %v349_v57  ;;  %v362_v44 = vshrl.u32 %v774_v0, %v350_v12 }
  0xde   : > { %v365_v45 = vshrl.u32 %v775_v7, %v350_v12  ;;  %v286_v47 = vmul.u32 %v908_v51, %v270_v27  ;;  %v351_v48 = vshrl.u32 %v770_v54, %v350_v12  ;;  %v364_v50 = vshll.u32 %v774_v0, %v349_v57 }
  0xdf   : > { %v360_v49 = vor.u32 %v359_v42, %v358_v41  ;;  %vm288_vm6 = vc.u32 %v921_v35, %v924_v36  ;;  %v289_v53 = vadd.s32 1, %v925_v37  ;;  %v363_v55 = vor.u32 %v362_v44, %v361_v43 }
  0xe0   : > { %vm367_vm7 = vcmp.lt.s32.totalorder %v911_v56, 1  ;;  %v366_v58 = vor.u32 %v365_v45, %v364_v50  ;;  %vm369_vm8 = vcmp.lt.s32.totalorder %v911_v56, 3  ;;  %vm370_vm9 = vcmp.lt.s32.totalorder %v911_v56, 4 }
  0xe1   : > { %v375_v59 = vsel %vm367_vm7, %v354_v38, %v357_v40  ;;  %v290_v52 = vsel %vm288_vm6, %v289_v53, %v925_v37  ;;  %v372_v60 = vsel %vm370_vm9, %v360_v49, 2102212464  ;;  %v376_v51 = vsel %vm370_vm9, %v363_v55, 920167782 }
  0xe2   : > { %v379_v54 = vsel %vm367_vm7, %v357_v40, %v360_v49  ;;  %v291_v61 = vadd.s32 %v290_v52, %v286_v47  ;;  %vm368_vm10 = vcmp.lt.s32.totalorder %v911_v56, 2  ;;  %v377_v57 = vsel %vm369_vm8, %v360_v49, %v376_v51 }
  0xe3   : > { %v380_v62 = vsel %vm370_vm9, %v366_v58, 1326507024  ;;  %v371_v63 = vsel %vm367_vm7, %v351_v48, %v354_v38  ;;  %v373_v0 = vsel %vm369_vm8, %v357_v40, %v372_v60  ;;  %v378_v1 = vsel %vm368_vm10, %v375_v59, %v377_v57 }
  0xe4   : > { %v381_v2 = vsel %vm369_vm8, %v363_v55, %v380_v62  ;;  %v292_v3 = vadd.s32 536870912, %v291_v61  ;;  %v935_v5 = vmul.u32.u64.low %v383_v46, %v378_v1  ;;  %v936_v6 = vmul.u32.u64.high %v383_v46, %v378_v1, %v935_v5 }
  0xe5   : > { %v382_v4 = vsel %vm368_vm10, %v379_v54, %v381_v2  ;;  %v374_v10 = vsel %vm368_vm10, %v371_v63, %v373_v0  ;;  %v287_v26 = vadd.s32 %v924_v36, %v921_v35  ;;  %vm323_vm5 = vweird.f32 %v894_v32 }
  0xe6   : > { %v938_v7 = vmul.u32.u64.low %v383_v46, %v382_v4  ;;  %v939_v8 = vmul.u32.u64.high %v383_v46, %v382_v4, %v938_v7  ;;  %v293_v9 = vshrl.u32 %v292_v3, 30  ;;  %v393_v12 = vadd.s32 1, %v936_v6 }
  0xe7   : > { %v390_v56 = vmul.u32 %v383_v46, %v374_v10  ;;  %vm427_vm9 = vweird.f32 %v896_v33 }
  0xe8   : > { %v294_v11 = vshll.u32 %v293_v9, 30  ;;  %vm392_vm11 = vc.u32 %v939_v8, %v935_v5  ;;  %v391_v47 = vadd.s32 %v935_v5, %v939_v8  ;;  %v317_v36 = vsub.s32 4, %v293_v9 }
  0xe9   : > { %v394_v14 = vsel %vm392_vm11, %v393_v12, %v936_v6 }
  0xea   : > { %v295_v13 = vsub.s32 %v291_v61, %v294_v11  ;;  %v395_v15 = vadd.s32 %v394_v14, %v390_v56  ;;  %v318_v51 = vsel %vm233_vm14, %v317_v36, %v293_v9 }
  0xeb   : > { %v320_v57 = vsel %vm232_vm15, 0, %v318_v51 }
  0xec   : > { %v297_v16 = vsub.s32 0, %v295_v13  ;;  %v396_v17 = vadd.s32 536870912, %v395_v15  ;;  %v324_v2 = vadd.s32 3, %v320_v57 }
  0xee   : > { %v543_v18 = vmin.u32 %v297_v16, %v295_v13  ;;  %v397_v19 = vshrl.u32 %v396_v17, 30  ;;  %v325_v5 = vand.u32 3, %v324_v2 }
  0xf0   : > { %v299_v20 = vclz %v543_v18  ;;  %v398_v21 = vshll.u32 %v397_v19, 30  ;;  %v421_v1 = vsub.s32 4, %v397_v19  ;;  %vm330_vm2 = vcmp.eq.s32.totalorder %v325_v5, 2 }
  0xf1   : > { %vm327_vm3 = vcmp.eq.s32.totalorder %v325_v5, 0  ;;  %vm326_vm4 = vcmp.lt.s32.totalorder %v325_v5, 2 }
  0xf2   : > { %v544_v22 = vadd.s32 4294967294, %v299_v20  ;;  %v399_v23 = vsub.s32 %v395_v15, %v398_v21  ;;  %v422_v4 = vsel %vm337_vm0, %v421_v1, %v397_v19 }
  0xf3   : > { %v424_v8 = vsel %vm336_vm1, 0, %v422_v4 }
  0xf4   : > { %vm545_vm12 = vcmp.lt.s32.totalorder %v544_v22, 0  ;;  %v401_v25 = vsub.s32 0, %v399_v23  ;;  %v428_v56 = vadd.s32 3, %v424_v8 }
  0xf5   : > { %v302_v24 = vsel %vm545_vm12, 0, %v544_v22 }
  0xf6   : > { %v303_v27 = vsub.s32 32, %v302_v24  ;;  %v307_v28 = vsub.s32 4294967266, %v302_v24  ;;  %v547_v29 = vmin.u32 %v401_v25, %v399_v23  ;;  %v304_v30 = vshll.u32 %v295_v13, %v302_v24 }
  0xf7   : > { %v429_v15 = vand.u32 3, %v428_v56 }
  0xf8   : > { %v305_v31 = vshrl.u32 %v287_v26, %v303_v27  ;;  %v308_v37 = vadd.s32 127, %v307_v28  ;;  %v403_v38 = vclz %v547_v29 }
  0xf9   : > { %vm434_vm6 = vcmp.eq.s32.totalorder %v429_v15, 2  ;;  %vm431_vm7 = vcmp.eq.s32.totalorder %v429_v15, 0  ;;  %vm430_vm8 = vcmp.lt.s32.totalorder %v429_v15, 2 }
  0xfa   : > { %v306_v40 = vor.u32 %v305_v31, %v304_v30  ;;  %v309_v41 = vshll.u32 %v308_v37, 23  ;;  %v548_v42 = vadd.s32 4294967294, %v403_v38 }
  0xfc   : > { %v310_v43 = vor.u32 4788187, %v309_v41  ;;  %vm549_vm13 = vcmp.lt.s32.totalorder %v548_v42, 0  ;;  %v313_v45 = vcvt.s32.f32 %v306_v40 }
  0xfd   : > { %v406_v46 = vsel %vm549_vm13, 0, %v548_v42 }
  0xfe   : > { %v311_v44 = vand.u32 2147483647, %v310_v43  ;;  %v407_v48 = vsub.s32 32, %v406_v46  ;;  %v411_v49 = vsub.s32 4294967266, %v406_v46  ;;  %v408_v50 = vshll.u32 %v399_v23, %v406_v46 }
 0x100   : > { %v314_v35 = vmul.f32 %v313_v45, %v311_v44  ;;  %v409_v53 = vshrl.u32 %v391_v47, %v407_v48  ;;  %v412_v55 = vadd.s32 127, %v411_v49 }
 0x102   : > { %v315_v58 = vxor.u32 2147483648, %v314_v35  ;;  %v410_v59 = vor.u32 %v409_v53, %v408_v50  ;;  %v413_v52 = vshll.u32 %v412_v55, 23 }
 0x104   : > { %v316_v60 = vsel %vm233_vm14, %v315_v58, %v314_v35  ;;  %v414_v61 = vor.u32 4788187, %v413_v52  ;;  %v417_v63 = vcvt.s32.f32 %v410_v59 }
 0x105   : > { %v319_v54 = vsel %vm232_vm15, %v894_v32, %v316_v60 }
 0x106   : > { %645 = vcosq.f32 %v319_v54  ;;  %v415_v62 = vand.u32 2147483647, %v414_v61 }
 0x107   : > { %647 = vsinq.f32 %v319_v54 }
 0x108   : > { %v418_v0 = vmul.f32 %v417_v63, %v415_v62 }
 0x10a   : > { %v419_v3 = vxor.u32 2147483648, %v418_v0 }
 0x10c   : > { %v420_v34 = vsel %vm337_vm0, %v419_v3, %v418_v0 }
 0x10d   : > { %v423_v6 = vsel %vm336_vm1, %v896_v33, %v420_v34 }
 0x10e   : > { %649 = vcosq.f32 %v423_v6 }
 0x10f   : > { %651 = vsinq.f32 %v423_v6 }
 0x110   : > { %v646_v7 = vpop.eup %645 }
 0x111   : > { %v648_v9 = vpop.eup %647  ;;  %v331_v10 = vxor.u32 2147483648, %v646_v7 }
 0x112   : > { %v328_v11 = vxor.u32 2147483648, %v648_v9 }
 0x113   : > { %v332_v12 = vsel %vm330_vm2, %v331_v10, %v648_v9 }
 0x114   : > { %v329_v13 = vsel %vm327_vm3, %v646_v7, %v328_v11 }
 0x115   : > { %v333_v39 = vsel %vm326_vm4, %v329_v13, %v332_v12 }
 0x116   : > { %v334_v14 = vsel %vm323_vm5, nan, %v333_v39 }
 0x117   : > { %439 = vst [vmem:[#allocation2] sm:$0xff] %v334_v14 }
 0x118   : > { %v650_v16 = vpop.eup %649 }
 0x119   : > { %v652_v17 = vpop.eup %651  ;;  %v435_v18 = vxor.u32 2147483648, %v650_v16 }
 0x11a   : > { %v432_v19 = vxor.u32 2147483648, %v652_v17 }
 0x11b   : > { %v436_v20 = vsel %vm434_vm6, %v435_v18, %v652_v17 }
 0x11c   : > { %v433_v21 = vsel %vm431_vm7, %v650_v16, %v432_v19 }
 0x11d   : > { %v437_v22 = vsel %vm430_vm8, %v433_v21, %v436_v20 }
 0x11e   : > { %v438_v23 = vsel %vm427_vm9, nan, %v437_v22 }
 0x11f   : > { %440 = vst [vmem:[#allocation2 + $0x8] sm:$0xff] %v438_v23 }
 0x120 PF: > { %v441_v32 = vld [vmem:[#allocation2] sm:$0xff]  ;;  %s555_s23 = sshll.u32 %s755_s12, 8  ;;  %s462_s29 = sshll.u32 %s888_s20, 4  ;;  %s463_s29 = int_to_ptr.vmem [resolvable:$true] %s462_s29 }
 0x121   : > { %443 = vst [vmem:[%s888_s20] sm:$0xff] %v441_v32  ;;  %s962_s28 = scalar_lea.hbm %s1008_s2, %s555_s23  ;;  %s446_s30 = scalar_lea.sflag [#allocation5], %s154_s16 }
 0x122   : > { %s681_s3 = scalar_lea.vmem %s463_s29, 256  ;;  %p1020_p10 = scmp.ne.s32.totalorder %s1013_s19, 0 }
 0x123   : > { %p682_p8 = scmp.ne.s32.totalorder %s463_s29, %s681_s3  ;;  %s776_s4 = smov [#allocation6]  }
 0x124   : > { %s685_s5 = sshll.u32 %s776_s4, 4  ;;  %s686_s5 = int_to_ptr.vmem [resolvable:$false] %s685_s5 }
 0x125   : > { %p683_p11 = pnand %p682_p8, %p1020_p10  ;;  %s687_s12 = scalar_lea.vmem %s686_s5, 512 }
 0x126   : > { %v442_v24 = vld [vmem:[#allocation2 + $0x8] sm:$0xff]  ;;  %p688_p1 = scmp.lt.s32.totalorder %s463_s29, %s686_s5  ;;  %p689_p3 = scmp.lt.s32.totalorder %s687_s12, %s681_s3 }
 0x127   : > { %444 = vst [vmem:[%s888_s20 + $0x8] sm:$0xff] %v442_v24  ;;  %p684_p13 = pneg %p683_p11 }
 0x128   : > { %p690_p5 = por %p689_p3, %p688_p1 }
 0x12a   : > { %p691_p6 = pnand %p690_p5, %p684_p13 }
 0x12c   : > { %694 = shalt.err (!%p691_p6)
}
 0x12d   : > { %s695_s6 = scalar_lea.hbm %s962_s28, 256  ;;  %s699_s15 = scalar_lea.hbm %s1008_s2, 512 }
 0x12e   : > { %p696_p7 = scmp.ne.s32.totalorder %s962_s28, %s695_s6  ;;  %p700_p0 = scmp.lt.u32.totalorder %s962_s28, %s1008_s2 }
 0x12f   : > { %p701_p2 = scmp.lt.u32.totalorder %s699_s15, %s695_s6  ;;  %p703_p8 = scmp.lt.u32.totalorder %s695_s6, %s962_s28 }
 0x130   : > { %p697_p9 = pnand %p696_p7, %p1020_p10 }
 0x131   : > { %p702_p4 = por %p701_p2, %p700_p0 }
 0x132   : > { %p698_p12 = pneg %p697_p9 }
 0x133   : > { %p704_p11 = por %p703_p8, %p702_p4 }
 0x135   : > { %p705_p13 = pnand %p704_p11, %p698_p12 }
 0x137   : > { %708 = shalt.err (!%p705_p13)
}
 0x138   : > { %568 = dma.vmem_to_hbm [thread:$0]  (%p1020_p10), %s463_s29, 256, %s962_s28, %s446_s30  }
 0x139 PF: > { %p580_p1 = scmp.ge.s32.totalorder %s763_s14, 2  ;;  %s474_s20 = sand.u32 1, %s743_s9  }
 0x13a   : > { %p1021_p3 = scmp.ne.s32.totalorder %s1014_s21, 0  ;;  %s475_s25 = scalar_lea.sflag [#allocation5], %s474_s20 }
 0x13c   : > { %p575_p5 = pnand %p580_p1, %p1021_p3 }
 0x13e   : > { %738 = dma.done.wait (!%p575_p5), %s475_s25, 256  }
 0x13f   : > { %740 = vsyncadd (!%p575_p5), %s475_s25, 4294967040  ;;  %s16_s14 = sadd.s32 1, %s763_s14   ;;  %s1022_s9 = smov %s747_s10 }
 0x140   : > { %p13_p6 = scmp.ge.s32.totalorder %s16_s14, 4   ;;  %s1023_s10 = smov %s751_s11 }
 0x141   : > { %s1024_s11 = smov %s845_s22  ;;  %s1025_s12 = smov %s759_s13 }
 0x142   : > { %s1026_s13 = smov %s1028_s17  ;;  %15 = sbr.rel (!%p13_p6) target bundleno = 5 (0x5), region = 72 }
 0x149   :  { %480 = vsyncpa [#allocation4], 1 }
 0x14a   :  { %482 = vsyncpa [#allocation4 + $0x1], 1 }
 0x14b   :  { %483 = vsyncpa [#allocation5], 1 }
 0x14c   :  { %485 = vsyncpa [#allocation5 + $0x1], 1 }

</bundles_post_ra>
